<compile_context>
chip_gen: v6e
topology: v6e:2x2x1
jax: 0.10.0
libtpu: 0.0.40
codegen_flags: <defaults>
</compile_context>

<pallas_src>
import jax
import jax.numpy as jnp
from jax.experimental import pallas as pl
from jax.experimental.pallas import tpu as pltpu


def _rope_kernel(inv_freq_ref, cos_ref, sin_ref):
    """Half-width compute kernel. inv_freq_ref is (1, embed_dim//2)."""
    tile_s = cos_ref.shape[0]
    half = inv_freq_ref.shape[1]
    # Absolute positions for this tile: int32 iota + tile offset, then cast to f32.
    row = jax.lax.broadcasted_iota(jnp.int32, (tile_s, half), 0)
    t = (row + pl.program_id(0) * tile_s).astype(jnp.float32)
    freqs = t * inv_freq_ref[...]                 # outer(t, inv_freq) -> (tile_s, half)
    c = jnp.cos(freqs)                            # transcendentals only on half width
    s = jnp.sin(freqs)
    # Duplicate halves in-register and store full-width once (matches cat([f, f], -1)).
    cos_ref[...] = jnp.concatenate([c, c], axis=-1)
    sin_ref[...] = jnp.concatenate([s, s], axis=-1)


def _round_up(x: int, m: int) -> int:
    return ((x + m - 1) // m) * m


def _select_tile_s(seq_len: int, embed_dim: int,
                   vmem_budget_bytes: int = 16 << 20, max_tile: int = 2048) -> int:
    """Pick the sequence-tile size.

    * 2 outputs x 2 pipeline buffers x TILE_S x embed_dim x 4B stays under the budget,
      so double-buffered output writeback survives v7x's 64 MiB VMEM.
    * Aim for >= ~4 grid steps so the "parallel" grid axis shards across v7x's 2 TCs.
    * TILE_S is a multiple of 8 sublanes unless one full-extent block covers seq_len.
    """
    bytes_per_row = 2 * 2 * embed_dim * 4
    cap = min(max_tile, max(8, vmem_budget_bytes // bytes_per_row))
    cap = max(8, (cap // 8) * 8)
    if seq_len <= 16:
        return seq_len                             # single full-extent block is legal
    tile = _round_up(pl.cdiv(seq_len, 4), 8)       # target ~4 grid steps
    return max(8, min(tile, cap))


def rope_embedding(seq_len: int, embed_dim: int, theta: float = 10000.0,
                   tile_s=None):
    """Returns (cos, sin), each of shape (seq_len, embed_dim), float32."""
    assert embed_dim % 2 == 0, "embed_dim must be even"
    half = embed_dim // 2

    # Deterministic "parameter" setup (matches the nn.Module __init__ buffer exactly).
    inv_freq = 1.0 / (theta ** (jnp.arange(0, embed_dim, 2, dtype=jnp.float32) / embed_dim))
    freq_in = inv_freq.reshape(1, half)

    if tile_s is None:
        TILE_S = _select_tile_s(seq_len, embed_dim)
    elif tile_s >= seq_len:
        TILE_S = seq_len
    else:
        TILE_S = max(8, (tile_s // 8) * 8)         # keep sublane alignment
    grid = (pl.cdiv(seq_len, TILE_S),)

    out_shape = (
        jax.ShapeDtypeStruct((seq_len, embed_dim), jnp.float32),  # cos
        jax.ShapeDtypeStruct((seq_len, embed_dim), jnp.float32),  # sin
    )

    cos, sin = pl.pallas_call(
        _rope_kernel,
        out_shape=out_shape,
        grid=grid,
        in_specs=[pl.BlockSpec((1, half), lambda i: (0, 0))],     # tiny, resident
        out_specs=(
            pl.BlockSpec((TILE_S, embed_dim), lambda i: (i, 0)),
            pl.BlockSpec((TILE_S, embed_dim), lambda i: (i, 0)),
        ),
        compiler_params=pltpu.CompilerParams(
            dimension_semantics=("parallel",),     # independent tiles -> megacore sharding
            vmem_limit_bytes=48 << 20,             # headroom over the 16 MiB output budget
        ),
    )(freq_in)
    return cos, sin


def _reference(seq_len, embed_dim, theta):
    inv_freq = 1.0 / (theta ** (jnp.arange(0, embed_dim, 2, dtype=jnp.float32) / embed_dim))
    t = jnp.arange(seq_len, dtype=jnp.float32)
    freqs = jnp.outer(t, inv_freq)
    freqs = jnp.concatenate([freqs, freqs], axis=-1)
    return jnp.cos(freqs), jnp.sin(freqs)


if __name__ == "__main__":
    key = jax.random.PRNGKey(0)  # no random inputs needed; kept for convention
    del key
    theta = 10000.0

    # Case 1: tiny shapes matching the module's toy usage (single full-extent block).
    # Case 2: head_dim=128 (half=64) — the common real case, previously on the slow
    #         full-width path — with a ragged last tile (40 rows -> tiles 16,16,8).
    # Case 3: half=128 lane-aligned, multi-tile grid (4 tiles of 16 rows).
    for seq_len, embed_dim in [(8, 32), (40, 128), (64, 256)]:
        cos, sin = rope_embedding(seq_len, embed_dim, theta)
        jax.block_until_ready((cos, sin))
        ref_cos, ref_sin = _reference(seq_len, embed_dim, theta)
        assert cos.shape == (seq_len, embed_dim) and sin.shape == (seq_len, embed_dim)
        assert jnp.allclose(cos, ref_cos, atol=1e-5, rtol=1e-5), ("cos", seq_len, embed_dim)
        assert jnp.allclose(sin, ref_sin, atol=1e-5, rtol=1e-5), ("sin", seq_len, embed_dim)

    print("KERNEL_OK")
</pallas_src>

<mosaic_0001>
module attributes {stable_mosaic.version = 11 : i64} {
  func.func @_rope_kernel(%arg0: i32, %arg1: memref<1x16xf32, #tpu.memory_space<vmem>>, %arg2: memref<8x32xf32, #tpu.memory_space<vmem>>, %arg3: memref<8x32xf32, #tpu.memory_space<vmem>>) attributes {dimension_semantics = [#tpu.dimension_semantics<parallel>], iteration_bounds = array<i64: 1>, scalar_prefetch = 0 : i64, scratch_operands = 0 : i64, tpu.core_type = #tpu.core_type<tc>, window_params = [{pipeline_mode = #tpu.pipeline_mode<synchronous>, transform_indices = @transform_0, window_bounds = array<i64: 1, 16>}, {transform_indices = @transform_1, window_bounds = array<i64: 8, 32>}, {transform_indices = @transform_2, window_bounds = array<i64: 8, 32>}]} {
    %0 = tpu.iota {dimensions = array<i32: 0>} : vector<8x16xi32>
    %c8_i32 = arith.constant 8 : i32
    %1 = arith.muli %arg0, %c8_i32 : i32
    %2 = vector.broadcast %1 : i32 to vector<8x16xi32>
    %3 = arith.addi %0, %2 : vector<8x16xi32>
    %4 = arith.sitofp %3 : vector<8x16xi32> to vector<8x16xf32>
    %c0 = arith.constant 0 : index
    %c0_0 = arith.constant 0 : index
    %5 = vector.load %arg1[%c0, %c0_0] : memref<1x16xf32, #tpu.memory_space<vmem>>, vector<1x16xf32>
    %6 = vector.broadcast %5 : vector<1x16xf32> to vector<8x16xf32>
    %7 = arith.mulf %4, %6 : vector<8x16xf32>
    %8 = math.cos %7 : vector<8x16xf32>
    %9 = math.sin %7 : vector<8x16xf32>
    %10 = tpu.concatenate %8, %8 in 1 : vector<8x16xf32>, vector<8x16xf32> -> vector<8x32xf32>
    %c0_1 = arith.constant 0 : index
    %c0_2 = arith.constant 0 : index
    %11 = vector.load %arg2[%c0_1, %c0_2] : memref<8x32xf32, #tpu.memory_space<vmem>>, vector<8x32xf32>
    tpu.vector_store %arg2[%c0_1, %c0_2], %10 {strides = array<i32>} : memref<8x32xf32, #tpu.memory_space<vmem>>, vector<8x32xf32>,
    %12 = tpu.concatenate %9, %9 in 1 : vector<8x16xf32>, vector<8x16xf32> -> vector<8x32xf32>
    %c0_3 = arith.constant 0 : index
    %c0_4 = arith.constant 0 : index
    %13 = vector.load %arg3[%c0_3, %c0_4] : memref<8x32xf32, #tpu.memory_space<vmem>>, vector<8x32xf32>
    tpu.vector_store %arg3[%c0_3, %c0_4], %12 {strides = array<i32>} : memref<8x32xf32, #tpu.memory_space<vmem>>, vector<8x32xf32>,
    return
  }
  func.func @transform_0(%arg0: i32) -> (i32, i32) {
    %c0_i32 = arith.constant 0 : i32
    %c0_i32_0 = arith.constant 0 : i32
    %c0_i32_1 = arith.constant 0 : i32
    return %c0_i32, %c0_i32_0 : i32, i32
  }
  func.func @transform_1(%arg0: i32) -> (i32, i32) {
    %c0_i32 = arith.constant 0 : i32
    %c0_i32_0 = arith.constant 0 : i32
    return %arg0, %c0_i32 : i32, i32
  }
  func.func @transform_2(%arg0: i32) -> (i32, i32) {
    %c0_i32 = arith.constant 0 : i32
    %c0_i32_0 = arith.constant 0 : i32
    return %arg0, %c0_i32 : i32, i32
  }
}

</mosaic_0001>

<bundles_post_ra>
// kernel: tpu_custom_call.1
= control target key start
LH: loop header
LB: loop body
LE: loop exit
PB: predicated region body
PF: predicated region fallthrough
CT: control target
= control target key end

     0   :  { %8 = vsyncpa [#allocation3], 0  ;;  %s440_s0 = inlined_call_operand.hbm [shape: f32[1,16], index: 0, kind: input, shape index: {}]   ;;  %s441_s1 = inlined_call_operand.hbm [shape: f32[8,32], index: 1, kind: output, shape index: {0}]   ;;  %s442_s2 = inlined_call_operand.hbm [shape: f32[8,32], index: 2, kind: output, shape index: {1}]  }
   0x1   :  { %9 = vsyncpa [#allocation4], 0 }
   0x2   :  { %10 = vsyncpa [#allocation7], 0  ;;  %s381_s9 = smov [#allocation2]  }
   0x3   :  { %s17_s10 = sshll.u32 %s381_s9, 4  ;;  %s18_s10 = int_to_ptr.vmem [resolvable:$true] %s17_s10 }
   0x4   :  { %s323_s11 = scalar_lea.vmem %s18_s10, 16  ;;  %s327_s12 = scalar_lea.vmem %s18_s10, 32 }
   0x5   :  { %p324_p0 = scmp.ne.s32.totalorder %s18_s10, %s323_s11  ;;  %p328_p1 = scmp.lt.s32.totalorder %s18_s10, %s18_s10 }
   0x6   :  { %p329_p2 = scmp.lt.s32.totalorder %s327_s12, %s323_s11 }
   0x8   :  { %p330_p3 = por %p329_p2, %p328_p1 }
   0xa   :  { %p331_p4 = pnand %p330_p3, %p324_p0 }
   0xc   :  { %334 = shalt.err (!%p331_p4)
}
   0xd   :  { %20 = dma.hbm_to_vmem [thread:$0]  %s440_s0, 16, %s18_s10, [#allocation3]  }
   0xe   :  { %375 = dma.done.wait [#allocation3], 16  }
   0xf   :  { %376 = vsyncadd [#allocation3], 4294967280  ;;  %v24_v0 = vlaneseq  ;;  %v288_v3 = vld [vmem:[#allocation2] ss:$0 sm:$0xff]  ;;  %v382_v16 = vmov 683565275  }
  0x10   :  { %v383_v18 = vmov 2475754826   ;;  %v384_v20 = vmov 2131351028   ;;  %v385_v22 = vmov 2102212464  }
  0x11   :  { %v25_v1 = vshrl.u32 %v24_v0, 7  ;;  %v386_v24 = vmov 920167782   ;;  %v387_v31 = vmov 1326507024   ;;  %s388_s0 = smov 16  }
  0x12   :  { %s389_s15 = smov [#allocation5]   ;;  %s390_s17 = smov [#allocation6]  }
  0x13   :  { %v29_v2 = vcvt.s32.f32 %v25_v1  ;;  %s265_s16 = sshll.u32 %s389_s15, 4  ;;  %s275_s18 = sshll.u32 %s390_s17, 4  ;;  %s266_s16 = int_to_ptr.vmem [resolvable:$true] %s265_s16  ;;  %s276_s18 = int_to_ptr.vmem [resolvable:$true] %s275_s18 }
  0x14   :  { %s335_s19 = scalar_lea.vmem %s266_s16, 128  ;;  %p340_p6 = scmp.lt.s32.totalorder %s266_s16, %s266_s16 }
  0x15   :  { %v409_v4 = vmul.f32 %v288_v3, %v29_v2  ;;  %p336_p5 = scmp.ne.s32.totalorder %s266_s16, %s335_s19  ;;  %p341_p7 = scmp.lt.s32.totalorder %s335_s19, %s335_s19 }
  0x17   :  { %v41_v5 = vand.u32 2139095040, %v409_v4  ;;  %v38_v7 = vand.u32 2147483647, %v409_v4  ;;  %vm40_vm7 = vcmp.lt.s32.totalorder %v409_v4, 0  ;;  %vm130_vm15 = vweird.f32 %v409_v4  ;;  %p342_p8 = por %p341_p7, %p340_p6 }
  0x19   :  { %v42_v6 = vshrl.u32 %v41_v5, 23  ;;  %v45_v10 = vand.u32 8388607, %v38_v7  ;;  %vm39_vm8 = vcmp.le.f32.partialorder %v38_v7, 0.7853982  ;;  %p343_p9 = pnand %p342_p8, %p336_p5 }
  0x1b   :  { %v289_v8 = vadd.s32 4294967169, %v42_v6  ;;  %v46_v13 = vor.u32 8388608, %v45_v10 }
  0x1d   :  { %v48_v9 = vadd.s32 1, %v289_v8  ;;  %v86_v33 = vshll.u32 %v46_v13, 8 }
  0x1f   :  { %vm49_vm0 = vcmp.gt.s32.totalorder %v48_v9, 0 }
  0x20   :  { %v50_v11 = vsel %vm49_vm0, %v48_v9, 0  ;;  %vm249_vm0 = vcmask 130048  }
  0x21   :  { %v52_v12 = vand.u32 31, %v50_v11  ;;  %v51_v14 = vshrl.u32 %v50_v11, 5 }
  0x23   :  { %v53_v15 = vsub.s32 32, %v52_v12  ;;  %v55_v17 = vshll.u32 %v382_v16, %v52_v12  ;;  %v58_v19 = vshll.u32 %v383_v18, %v52_v12  ;;  %v61_v21 = vshll.u32 %v384_v20, %v52_v12 }
  0x24   :  { %v64_v23 = vshll.u32 %v385_v22, %v52_v12  ;;  %v67_v25 = vshll.u32 %v386_v24, %v52_v12  ;;  %vm70_vm1 = vcmp.lt.s32.totalorder %v51_v14, 1  ;;  %vm73_vm2 = vcmp.lt.s32.totalorder %v51_v14, 4 }
  0x25   :  { %v54_v26 = vshrl.u32 %v382_v16, %v53_v15  ;;  %v56_v27 = vshrl.u32 %v383_v18, %v53_v15  ;;  %v59_v28 = vshrl.u32 %v384_v20, %v53_v15  ;;  %v62_v29 = vshrl.u32 %v385_v22, %v53_v15 }
  0x26   :  { %v65_v30 = vshrl.u32 %v386_v24, %v53_v15  ;;  %v68_v32 = vshrl.u32 %v387_v31, %v53_v15  ;;  %vm71_vm3 = vcmp.lt.s32.totalorder %v51_v14, 2  ;;  %vm72_vm4 = vcmp.lt.s32.totalorder %v51_v14, 3 }
  0x27   :  { %v57_v34 = vor.u32 %v56_v27, %v55_v17  ;;  %v60_v35 = vor.u32 %v59_v28, %v58_v19  ;;  %v63_v36 = vor.u32 %v62_v29, %v61_v21 }
  0x28   :  { %v66_v37 = vor.u32 %v65_v30, %v64_v23  ;;  %v69_v38 = vor.u32 %v68_v32, %v67_v25 }
  0x29   :  { %v74_v39 = vsel %vm70_vm1, %v54_v26, %v57_v34  ;;  %v75_v40 = vsel %vm73_vm2, %v63_v36, 2102212464  ;;  %v78_v41 = vsel %vm70_vm1, %v57_v34, %v60_v35  ;;  %v82_v42 = vsel %vm70_vm1, %v60_v35, %v63_v36 }
  0x2a   :  { %v76_v43 = vsel %vm72_vm4, %v60_v35, %v75_v40  ;;  %v79_v44 = vsel %vm73_vm2, %v66_v37, 920167782  ;;  %v83_v45 = vsel %vm73_vm2, %v69_v38, 1326507024  ;;  %vm251_vm1 = vcmask 261120  }
  0x2b   :  { %v80_v46 = vsel %vm72_vm4, %v63_v36, %v79_v44  ;;  %v84_v47 = vsel %vm72_vm4, %v66_v37, %v83_v45  ;;  %v77_v48 = vsel %vm71_vm3, %v74_v39, %v76_v43 }
  0x2c   :  { %v81_v49 = vsel %vm71_vm3, %v78_v41, %v80_v46  ;;  %v85_v50 = vsel %vm71_vm3, %v82_v42, %v84_v47  ;;  %v93_v55 = vmul.u32 %v86_v33, %v77_v48 }
  0x2d   :  { %v415_v51 = vmul.u32.u64.low %v86_v33, %v85_v50  ;;  %v416_v52 = vmul.u32.u64.high %v86_v33, %v85_v50, %v415_v51  ;;  %v418_v53 = vmul.u32.u64.low %v86_v33, %v81_v49  ;;  %v419_v54 = vmul.u32.u64.high %v86_v33, %v81_v49, %v418_v53 }
  0x2f   :  { %vm95_vm5 = vc.u32 %v416_v52, %v418_v53  ;;  %v96_v56 = vadd.s32 1, %v419_v54  ;;  %v94_v3 = vadd.s32 %v418_v53, %v416_v52 }
  0x31   :  { %v97_v57 = vsel %vm95_vm5, %v96_v56, %v419_v54 }
  0x32   :  { %v98_v58 = vadd.s32 %v97_v57, %v93_v55 }
  0x34   :  { %v99_v59 = vadd.s32 536870912, %v98_v58 }
  0x36   :  { %v100_v60 = vshrl.u32 %v99_v59, 30 }
  0x38   :  { %v101_v61 = vshll.u32 %v100_v60, 30  ;;  %v124_v19 = vsub.s32 4, %v100_v60 }
  0x3a   :  { %v102_v62 = vsub.s32 %v98_v58, %v101_v61  ;;  %v125_v22 = vsel %vm40_vm7, %v124_v19, %v100_v60 }
  0x3b   :  { %v127_v23 = vsel %vm39_vm8, 0, %v125_v22 }
  0x3c   :  { %v104_v63 = vsub.s32 0, %v102_v62  ;;  %v234_v24 = vadd.s32 3, %v127_v23  ;;  %v131_v25 = vand.u32 3, %v127_v23 }
  0x3e   :  { %v290_v0 = vmin.u32 %v104_v63, %v102_v62  ;;  %v235_v26 = vand.u32 3, %v234_v24  ;;  %vm136_vm9 = vcmp.eq.s32.totalorder %v131_v25, 2  ;;  %vm133_vm11 = vcmp.eq.s32.totalorder %v131_v25, 0 }
  0x3f   :  { %vm132_vm13 = vcmp.lt.s32.totalorder %v131_v25, 2 }
  0x40   :  { %v106_v1 = vclz %v290_v0  ;;  %vm240_vm10 = vcmp.eq.s32.totalorder %v235_v26, 2  ;;  %vm237_vm12 = vcmp.eq.s32.totalorder %v235_v26, 0  ;;  %vm236_vm14 = vcmp.lt.s32.totalorder %v235_v26, 2 }
  0x42   :  { %v291_v2 = vadd.s32 4294967294, %v106_v1 }
  0x44   :  { %vm292_vm6 = vcmp.lt.s32.totalorder %v291_v2, 0 }
  0x45   :  { %v109_v5 = vsel %vm292_vm6, 0, %v291_v2 }
  0x46   :  { %v110_v6 = vsub.s32 32, %v109_v5  ;;  %v111_v8 = vshll.u32 %v102_v62, %v109_v5  ;;  %v114_v9 = vsub.s32 4294967266, %v109_v5 }
  0x48   :  { %v112_v10 = vshrl.u32 %v94_v3, %v110_v6  ;;  %v115_v11 = vadd.s32 127, %v114_v9 }
  0x4a   :  { %v113_v12 = vor.u32 %v112_v10, %v111_v8  ;;  %v116_v13 = vshll.u32 %v115_v11, 23 }
  0x4c   :  { %v117_v14 = vor.u32 4788187, %v116_v13  ;;  %v120_v15 = vcvt.s32.f32 %v113_v12 }
  0x4e   :  { %v118_v16 = vand.u32 2147483647, %v117_v14 }
  0x50   :  { %v121_v17 = vmul.f32 %v120_v15, %v118_v16 }
  0x52   :  { %v122_v18 = vxor.u32 2147483648, %v121_v17 }
  0x54   :  { %v123_v20 = vsel %vm40_vm7, %v122_v18, %v121_v17 }
  0x55   :  { %v126_v21 = vsel %vm39_vm8, %v409_v4, %v123_v20 }
  0x56   :  { %311 = vcosq.f32 %v126_v21 }
  0x57   :  { %313 = vsinq.f32 %v126_v21 }
  0x63   :  { %v312_v27 = vpop.eup %311 }
  0x64   :  { %v314_v28 = vpop.eup %313  ;;  %v137_v29 = vxor.u32 2147483648, %v312_v27 }
  0x65   :  { %v134_v7 = vxor.u32 2147483648, %v314_v28 }
  0x66   :  { %v138_v30 = vsel %vm136_vm9, %v137_v29, %v314_v28  ;;  %v242_v31 = vsel %vm240_vm10, %v137_v29, %v314_v28 }
  0x67   :  { %v135_v32 = vsel %vm133_vm11, %v312_v27, %v134_v7  ;;  %v239_v33 = vsel %vm237_vm12, %v312_v27, %v134_v7 }
  0x68   :  { %v139_v34 = vsel %vm132_vm13, %v135_v32, %v138_v30  ;;  %v243_v35 = vsel %vm236_vm14, %v239_v33, %v242_v31 }
  0x69   :  { %v140_v36 = vsel %vm130_vm15, nan, %v139_v34  ;;  %v244_v37 = vsel %vm130_vm15, nan, %v243_v35 }
  0x6a   :  { %246 = vrot.lane.b32.xlu0 %v140_v36, %s388_s0 }
  0x6e   :  { %254 = vrot.lane.b32.xlu0 %v244_v37, %s388_s0 }
  0xdc   :  { %v247_v38 = vpop.permute.xlu0 %246 }
  0xdd   :  { %v250_v39 = vsel %vm249_vm0, %v140_v36, %v247_v38 }
  0xde   :  { %252 = vst.msk [vmem:[#allocation5] sm:$0xff] %vm251_vm1, %v250_v39 }
  0xdf   :  { %346 = shalt.err (!%p343_p9)
}
  0xe0   :  { %268 = dma.vmem_to_hbm [thread:$0]  %s266_s16, 128, %s441_s1, [#allocation4]   ;;  %v255_v4 = vpop.permute.xlu0 %254 }
  0xe1   :  { %v257_v40 = vsel %vm249_vm0, %v244_v37, %v255_v4  ;;  %s355_s22 = scalar_lea.vmem %s276_s18, 128  ;;  %p360_p11 = scmp.lt.s32.totalorder %s276_s18, %s276_s18 }
  0xe2   :  { %258 = vst.msk [vmem:[#allocation6] sm:$0xff] %vm251_vm1, %v257_v40  ;;  %p356_p10 = scmp.ne.s32.totalorder %s276_s18, %s355_s22  ;;  %p361_p12 = scmp.lt.s32.totalorder %s355_s22, %s355_s22 }
  0xe4   :  { %p362_p13 = por %p361_p12, %p360_p11 }
  0xe6   :  { %p363_p0 = pnand %p362_p13, %p356_p10 }
  0xe8   :  { %366 = shalt.err (!%p363_p0)
}
  0xe9   :  { %278 = dma.vmem_to_hbm [thread:$0]  %s276_s18, 128, %s442_s2, [#allocation7]  }
  0xea   :  { %377 = dma.done.wait [#allocation4], 128  }
  0xeb   :  { %378 = vsyncadd [#allocation4], 4294967168 }
  0xec   :  { %379 = dma.done.wait [#allocation7], 128  }
  0xed   :  { %380 = vsyncadd [#allocation7], 4294967168 }
  0xee   :  { %285 = vsyncpa [#allocation3], 1 }
  0xef   :  { %286 = vsyncpa [#allocation4], 1 }
  0xf0   :  { %287 = vsyncpa [#allocation7], 1 }

</bundles_post_ra>
